<compile_context>
chip_gen: v7x
topology: tpu7x:2x2x1
jax: 0.10.0
libtpu: 0.0.40
codegen_flags: <defaults>
</compile_context>

<pallas_src>
from typing import NamedTuple

import jax
import jax.numpy as jnp
from jax.experimental import pallas as pl
from jax.experimental.pallas import tpu as pltpu


# --------------------------------------------------------------------------
# Small helpers
# --------------------------------------------------------------------------
def _round_up(x, m):
    return (x + m - 1) // m * m


def _pick_divisor_tile(dim, pref):
    """Largest multiple-of-128 tile <= pref that divides dim (dim % 128 == 0)."""
    t = min(pref, dim)
    while dim % t != 0:
        t -= 128
    return t


def _vmem_capacity_bytes():
    """Per-core VMEM capacity; conservative (v7x) fallback if query fails."""
    try:
        info = pltpu.get_tpu_info()
        cap = getattr(info, "vmem_capacity_bytes", None)
        if cap:
            return int(cap)
    except Exception:
        pass
    return 64 * 1024 * 1024


def _vmem_limit(footprint, cap):
    """Scoped-VMEM limit sized from the actual block footprint, capped below
    physical capacity, with a floor at the common 32 MiB default."""
    return int(min(cap * 0.85, max(2 * footprint, 32 * 1024 * 1024)))


# --------------------------------------------------------------------------
# One-time weight preparation (hoisted out of the forward path)
# --------------------------------------------------------------------------
class PreparedConnectorWeight(NamedTuple):
    w_kn: jax.Array       # (Kp, Np) bf16, canonical (K, N) layout, zero-padded
    in_features: int      # K  (vision_hidden * concat_factor)
    out_features: int     # N  (text_hidden)


def prepare_connector_weight(proj_weight):
    """Prepare the nn.Linear weight once: (N, K) PyTorch (out, in) layout ->
    bf16 (K, N), with K and N zero-padded to multiples of 128.  Cache and
    reuse the result across forward calls."""
    n_out, k_in = proj_weight.shape
    kp = _round_up(k_in, 128)
    np_pad = _round_up(n_out, 128)
    w_kn = jnp.asarray(proj_weight).astype(jnp.bfloat16).T          # (K, N)
    if (kp, np_pad) != (k_in, n_out):
        w_kn = jnp.pad(w_kn, ((0, kp - k_in), (0, np_pad - n_out)))  # zeros
    return PreparedConnectorWeight(w_kn=w_kn, in_features=k_in, out_features=n_out)


# --------------------------------------------------------------------------
# Kernels
# --------------------------------------------------------------------------
def _proj_fullk_kernel(x_ref, w_ref, o_ref):
    """o = x @ w for a full-K tile.  x: (tm, K) native dtype, w: (K, tn) bf16."""
    x = x_ref[...]
    if x.dtype != jnp.bfloat16:
        x = x.astype(jnp.bfloat16)            # cast in VMEM; no HBM copy of X
    o_ref[...] = jnp.dot(
        x, w_ref[...], preferred_element_type=jnp.float32
    ).astype(o_ref.dtype)


def _proj_splitk_kernel(x_ref, w_ref, o_ref, acc_ref):
    """Split-K fallback with an f32 VMEM accumulator (K grid axis innermost)."""
    @pl.when(pl.program_id(2) == 0)
    def _():
        acc_ref[...] = jnp.zeros_like(acc_ref)

    x = x_ref[...]
    if x.dtype != jnp.bfloat16:
        x = x.astype(jnp.bfloat16)
    acc_ref[...] += jnp.dot(x, w_ref[...], preferred_element_type=jnp.float32)

    @pl.when(pl.program_id(2) == pl.num_programs(2) - 1)
    def _():
        o_ref[...] = acc_ref[...].astype(o_ref.dtype)


# --------------------------------------------------------------------------
# Projection matmul dispatch
# --------------------------------------------------------------------------
def _projection_matmul(x2d, w_kn, n_out, out_dtype, *, tm=None, tn=None, tk=None):
    """x2d: (M, K) native dtype; w_kn: (Kp, Np) bf16 prepared weight.
    Returns (M, n_out) in out_dtype.  tm/tn/tk override the auto tiling (tests)."""
    m, k = x2d.shape
    kp, np_pad = w_kn.shape
    assert k <= kp and kp % 128 == 0 and np_pad % 128 == 0
    if k < kp:
        # Weight K-pad rows are zeros, so any X pad value is harmless; use zeros.
        x2d = jnp.pad(x2d, ((0, 0), (0, kp - k)))

    out_item = jnp.dtype(out_dtype).itemsize
    cap = _vmem_capacity_bytes()
    budget = int(cap * 0.65)

    if tn is None:
        tn = _pick_divisor_tile(np_pad, 512)
    assert np_pad % tn == 0

    w_buf_bytes = 2 * kp * tn * 2                     # double-buffered bf16 W tile

    def resident_bytes(x_item):
        # double-buffered X block + W tile + double-buffered out tile
        return 2 * m * kp * x_item + w_buf_bytes + 2 * m * tn * out_item

    # ---------------- mode selection ----------------
    if tk is not None and tk < kp:
        mode = "splitk"
        if tm is None:
            tm = min(256, _round_up(m, 8))
    elif tm is not None:
        mode = "resident" if tm >= m else "tiled"
    else:
        x_item = x2d.dtype.itemsize
        if resident_bytes(x_item) <= budget:
            mode = "resident"                         # X resident in native dtype
        elif x2d.dtype != jnp.bfloat16 and resident_bytes(2) <= budget:
            # One bf16 copy of X in HBM buys full residency: both operands are
            # then DMA'd exactly once (weight-once dominates the extra X bytes).
            x2d = x2d.astype(jnp.bfloat16)
            mode = "resident"
        else:
            tm = 256
            x_item = x2d.dtype.itemsize

            def tiled_bytes(t):
                return 2 * t * kp * x_item + w_buf_bytes + 2 * t * tn * out_item

            while tm > 64 and tiled_bytes(tm) > budget:
                tm //= 2
            if tiled_bytes(tm) <= budget:
                mode = "tiled"
            else:
                mode = "splitk"
                tk = _pick_divisor_tile(kp, 2048)

    x_item = x2d.dtype.itemsize
    flops = 2 * m * kp * np_pad

    # ---------------- resident: grid over N tiles only ----------------
    if mode == "resident":
        grid = (np_pad // tn,)
        footprint = resident_bytes(x_item)
        cost = pl.CostEstimate(
            flops=flops, transcendentals=0,
            bytes_accessed=m * kp * x_item + kp * np_pad * 2 + m * np_pad * out_item)
        y = pl.pallas_call(
            _proj_fullk_kernel,
            out_shape=jax.ShapeDtypeStruct((m, np_pad), out_dtype),
            grid=grid,
            in_specs=[
                pl.BlockSpec((m, kp), lambda j: (0, 0)),      # grid-invariant X
                pl.BlockSpec((kp, tn), lambda j: (0, j)),     # W streamed once
            ],
            out_specs=pl.BlockSpec((m, tn), lambda j: (0, j)),
            compiler_params=pltpu.CompilerParams(
                dimension_semantics=("parallel",),            # v7x: shard N across TCs
                vmem_limit_bytes=_vmem_limit(footprint, cap)),
            cost_estimate=cost,
        )(x2d, w_kn)
        return y[:, :n_out]

    # ---------------- tiled full-K: N outer, M inner (W fetched once) ----------------
    if mode == "tiled":
        mp = _round_up(m, tm)
        if mp != m:
            x2d = jnp.pad(x2d, ((0, mp - m), (0, 0)))
        grid = (np_pad // tn, mp // tm)
        footprint = 2 * tm * kp * x_item + w_buf_bytes + 2 * tm * tn * out_item
        cost = pl.CostEstimate(
            flops=flops, transcendentals=0,
            bytes_accessed=(mp * kp * x_item * (np_pad // tn)   # X re-streamed per N tile
                            + kp * np_pad * 2                   # W once (invariant inner)
                            + mp * np_pad * out_item))
        y = pl.pallas_call(
            _proj_fullk_kernel,
            out_shape=jax.ShapeDtypeStruct((mp, np_pad), out_dtype),
            grid=grid,
            in_specs=[
                pl.BlockSpec((tm, kp), lambda j, i: (i, 0)),
                pl.BlockSpec((kp, tn), lambda j, i: (0, j)),   # constant across inner i
            ],
            out_specs=pl.BlockSpec((tm, tn), lambda j, i: (i, j)),
            compiler_params=pltpu.CompilerParams(
                dimension_semantics=("parallel", "parallel"),
                vmem_limit_bytes=_vmem_limit(footprint, cap)),
            cost_estimate=cost,
        )(x2d, w_kn)
        return y[:m, :n_out]

    # ---------------- split-K fallback (very large K) ----------------
    assert kp % tk == 0
    mp = _round_up(m, tm)
    if mp != m:
        x2d = jnp.pad(x2d, ((0, mp - m), (0, 0)))
    grid = (np_pad // tn, mp // tm, kp // tk)
    footprint = (2 * tm * tk * x_item + 2 * tk * tn * 2
                 + 2 * tm * tn * out_item + tm * tn * 4)
    cost = pl.CostEstimate(
        flops=flops, transcendentals=0,
        bytes_accessed=(mp * kp * x_item * (np_pad // tn)
                        + kp * np_pad * 2 * (mp // tm)
                        + mp * np_pad * out_item))
    y = pl.pallas_call(
        _proj_splitk_kernel,
        out_shape=jax.ShapeDtypeStruct((mp, np_pad), out_dtype),
        grid=grid,
        in_specs=[
            pl.BlockSpec((tm, tk), lambda j, i, kk: (i, kk)),
            pl.BlockSpec((tk, tn), lambda j, i, kk: (kk, j)),
        ],
        out_specs=pl.BlockSpec((tm, tn), lambda j, i, kk: (i, j)),
        scratch_shapes=[pltpu.VMEM((tm, tn), jnp.float32)],
        compiler_params=pltpu.CompilerParams(
            dimension_semantics=("parallel", "parallel", "arbitrary"),
            vmem_limit_bytes=_vmem_limit(footprint, cap)),
        cost_estimate=cost,
    )(x2d, w_kn)
    return y[:m, :n_out]


# --------------------------------------------------------------------------
# DetikzifyConnector forward
# --------------------------------------------------------------------------
def detikzify_connector_forward(image_hidden_states, proj_weight, concat_factor=3,
                                *, out_dtype=None):
    """
    image_hidden_states: (bsz, seq, vision_hidden)
    proj_weight: raw (text_hidden, vision_hidden*concat_factor) PyTorch Linear
                 weight OR a PreparedConnectorWeight (preferred: prepare once).
    returns:     (bsz, seq // concat_factor, text_hidden)
    """
    if not isinstance(proj_weight, PreparedConnectorWeight):
        proj_weight = prepare_connector_weight(proj_weight)

    bsz, seq, embed_dim = image_hidden_states.shape
    assert seq % concat_factor == 0
    new_seq = seq // concat_factor
    k_in = embed_dim * concat_factor
    assert k_in == proj_weight.in_features
    n_out = proj_weight.out_features
    if out_dtype is None:
        out_dtype = image_hidden_states.dtype

    # concatenate(): row-major reshape identical to torch.reshape, then flatten
    # (bsz, new_seq) -> M so the projection is one 2-D matmul.
    x2d = image_hidden_states.reshape(bsz * new_seq, k_in)
    y2d = _projection_matmul(x2d, proj_weight.w_kn, n_out, out_dtype)
    return y2d.reshape(bsz, new_seq, n_out)


# --------------------------------------------------------------------------
# Demo / correctness check
# --------------------------------------------------------------------------
if __name__ == "__main__":
    # Small, forward-consistent shapes:
    #   vision hidden = 32, concat_factor = 3 -> projection input K = 96
    #   text hidden = 64, batch = 2, seq = 12 (divisible by concat_factor)
    bsz, seq, vision_hidden = 2, 12, 32
    concat_factor = 3
    text_hidden = 64

    key = jax.random.PRNGKey(0)
    k_x, k_w = jax.random.split(key)
    image_hidden_states = jax.random.normal(
        k_x, (bsz, seq, vision_hidden), dtype=jnp.float32)
    proj_weight = jax.random.normal(
        k_w, (text_hidden, vision_hidden * concat_factor), dtype=jnp.float32) * 0.02

    # One-time weight prep (bf16, (K, N) layout, tile-aligned) — cache & reuse.
    prepared = prepare_connector_weight(proj_weight)

    out = detikzify_connector_forward(image_hidden_states, prepared, concat_factor)
    out = jax.block_until_ready(out)
    assert out.shape == (bsz, seq // concat_factor, text_hidden)
    assert out.dtype == image_hidden_states.dtype

    # Reference 1: same math with bf16 operand rounding + f32 accumulation.
    x2d = image_hidden_states.reshape(bsz * (seq // concat_factor), -1)
    x_b = x2d.astype(jnp.bfloat16).astype(jnp.float32)
    w_b = proj_weight.astype(jnp.bfloat16).astype(jnp.float32)
    ref_b = (x_b @ w_b.T).reshape(bsz, seq // concat_factor, text_hidden)
    assert jnp.allclose(out, ref_b, atol=1e-3, rtol=1e-3)

    # Reference 2: full-f32 PyTorch-equivalent math (loose tol, bf16 rounding).
    ref_f32 = (x2d @ proj_weight.T).reshape(bsz, seq // concat_factor, text_hidden)
    assert jnp.allclose(out, ref_f32, atol=3e-2, rtol=3e-2)

    # Also exercise the streamed (tiled) and split-K fallback kernels with
    # tiny forced tiles so every code path is compiled and checked.
    xs = jax.random.normal(jax.random.PRNGKey(1), (32, 256), dtype=jnp.float32)
    ws = jax.random.normal(jax.random.PRNGKey(2), (128, 256), dtype=jnp.float32) * 0.02
    wp = prepare_connector_weight(ws)
    ref_s = (xs.astype(jnp.bfloat16).astype(jnp.float32)
             @ ws.astype(jnp.bfloat16).astype(jnp.float32).T)

    y_tiled = _projection_matmul(xs, wp.w_kn, wp.out_features, jnp.float32,
                                 tm=8, tn=128)
    y_tiled = jax.block_until_ready(y_tiled)
    assert jnp.allclose(y_tiled, ref_s, atol=1e-3, rtol=1e-3)

    y_split = _projection_matmul(xs, wp.w_kn, wp.out_features, jnp.float32,
                                 tm=16, tn=128, tk=128)
    y_split = jax.block_until_ready(y_split)
    assert jnp.allclose(y_split, ref_s, atol=1e-3, rtol=1e-3)

    print("KERNEL_OK")
</pallas_src>

<mosaic_0001>
module attributes {stable_mosaic.version = 11 : i64} {
  func.func @_proj_fullk_kernel(%arg0: i32, %arg1: memref<8x128xf32, #tpu.memory_space<vmem>>, %arg2: memref<128x128xbf16, #tpu.memory_space<vmem>>, %arg3: memref<8x128xf32, #tpu.memory_space<vmem>>) attributes {dimension_semantics = [#tpu.dimension_semantics<parallel>], iteration_bounds = array<i64: 1>, scalar_prefetch = 0 : i64, scratch_operands = 0 : i64, tpu.core_type = #tpu.core_type<tc>, window_params = [{pipeline_mode = #tpu.pipeline_mode<synchronous>, transform_indices = @transform_0, window_bounds = array<i64: 8, 128>}, {transform_indices = @transform_1, window_bounds = array<i64: 128, 128>}, {transform_indices = @transform_2, window_bounds = array<i64: 8, 128>}]} {
    %c0 = arith.constant 0 : index
    %c0_0 = arith.constant 0 : index
    %0 = vector.load %arg1[%c0, %c0_0] : memref<8x128xf32, #tpu.memory_space<vmem>>, vector<8x128xf32>
    %1 = arith.truncf %0 : vector<8x128xf32> to vector<8x128xbf16>
    %c0_1 = arith.constant 0 : index
    %c0_2 = arith.constant 0 : index
    %2 = vector.load %arg2[%c0_1, %c0_2] : memref<128x128xbf16, #tpu.memory_space<vmem>>, vector<128x128xbf16>
    %cst = arith.constant dense<0.000000e+00> : vector<8x128xf32>
    %3 = tpu.matmul %1, %2, %cst {dimension_numbers = #tpu.dot_dimension_numbers<[1], [0], [0], [1], [0, 0, 1, 1], [], []>} : vector<8x128xbf16>, vector<128x128xbf16>, vector<8x128xf32> -> vector<8x128xf32>
    %c0_3 = arith.constant 0 : index
    %c0_4 = arith.constant 0 : index
    %4 = vector.load %arg3[%c0_3, %c0_4] : memref<8x128xf32, #tpu.memory_space<vmem>>, vector<8x128xf32>
    tpu.vector_store %arg3[%c0_3, %c0_4], %3 {strides = array<i32>} : memref<8x128xf32, #tpu.memory_space<vmem>>, vector<8x128xf32>,
    return
  }
  func.func @transform_0(%arg0: i32) -> (i32, i32) {
    %c0_i32 = arith.constant 0 : i32
    %c0_i32_0 = arith.constant 0 : i32
    %c0_i32_1 = arith.constant 0 : i32
    return %c0_i32, %c0_i32_0 : i32, i32
  }
  func.func @transform_1(%arg0: i32) -> (i32, i32) {
    %c0_i32 = arith.constant 0 : i32
    %c0_i32_0 = arith.constant 0 : i32
    return %c0_i32, %arg0 : i32, i32
  }
  func.func @transform_2(%arg0: i32) -> (i32, i32) {
    %c0_i32 = arith.constant 0 : i32
    %c0_i32_0 = arith.constant 0 : i32
    return %c0_i32, %arg0 : i32, i32
  }
}

</mosaic_0001>

<bundles_post_ra>
// kernel: tpu_custom_call.1
= control target key start
LH: loop header
LB: loop body
LE: loop exit
PB: predicated region body
PF: predicated region fallthrough
CT: control target
= control target key end

     0   :  { %7 = vsyncpa [#allocation3], 0  ;;  %s351_s0 = inlined_call_operand.hbm [shape: f32[8,128], index: 0, kind: input, shape index: {}]   ;;  %s352_s1 = inlined_call_operand.hbm [shape: bf16[128,128], index: 1, kind: input, shape index: {}]   ;;  %s353_s2 = inlined_call_operand.hbm [shape: f32[8,128], index: 2, kind: output, shape index: {}]  }
   0x1   :  { %8 = vsyncpa [#allocation6], 0 }
   0x2   :  { %9 = vsyncpa [#allocation4], 0  ;;  %s286_s9 = smov [#allocation2]   ;;  %s287_s11 = smov [#allocation5]  }
   0x3   :  { %s16_s10 = sshll.u32 %s286_s9, 4  ;;  %s25_s12 = sshll.u32 %s287_s11, 4  ;;  %s17_s10 = int_to_ptr.vmem [resolvable:$true] %s16_s10  ;;  %s308_s12 = int_to_ptr.vmem [resolvable:$true] %s25_s12 }
   0x4   :  { %s214_s15 = scalar_lea.hbm %s351_s0, 128 }
   0x5   :  { %p215_p0 = scmp.ne.s32.totalorder %s351_s0, %s214_s15  ;;  %p218_p1 = scmp.lt.u32.totalorder %s214_s15, %s351_s0 }
   0x7   :  { %p220_p2 = pnand %p218_p1, %p215_p0 }
   0x9   :  { %223 = shalt.err (!%p220_p2)
}
   0xa   :  { %s224_s20 = scalar_lea.vmem %s17_s10, 128  ;;  %p229_p4 = scmp.lt.s32.totalorder %s17_s10, %s17_s10 }
   0xb   :  { %p225_p3 = scmp.ne.s32.totalorder %s17_s10, %s224_s20  ;;  %p230_p5 = scmp.lt.s32.totalorder %s224_s20, %s224_s20 }
   0xd   :  { %p231_p6 = por %p230_p5, %p229_p4 }
   0xf   :  { %p232_p7 = pnand %p231_p6, %p225_p3 }
  0x11   :  { %235 = shalt.err (!%p232_p7)
}
  0x12   :  { %19 = dma.hbm_to_vmem [thread:$0]  %s351_s0, 128, %s17_s10, [#allocation3]  }
  0x13   :  { %s236_s25 = scalar_lea.hbm %s352_s1, 1024 }
  0x14   :  { %p237_p8 = scmp.ne.s32.totalorder %s352_s1, %s236_s25  ;;  %p240_p9 = scmp.lt.u32.totalorder %s236_s25, %s352_s1 }
  0x16   :  { %p242_p10 = pnand %p240_p9, %p237_p8 }
  0x18   :  { %245 = shalt.err (!%p242_p10)
}
  0x19   :  { %s246_s30 = scalar_lea.vmem %s308_s12, 1024  ;;  %p251_p12 = scmp.lt.s32.totalorder %s308_s12, %s308_s12 }
  0x1a   :  { %p247_p11 = scmp.ne.s32.totalorder %s308_s12, %s246_s30  ;;  %p252_p13 = scmp.lt.s32.totalorder %s246_s30, %s246_s30 }
  0x1c   :  { %p253_p0 = por %p252_p13, %p251_p12 }
  0x1e   :  { %p254_p1 = pnand %p253_p0, %p247_p11 }
  0x20   :  { %257 = shalt.err (!%p254_p1)
}
  0x21   :  { %s288_s0 = smov 64   ;;  %s289_s3 = smov 4  }
  0x22   :  { %31 = dma.hbm_to_vmem [thread:$0]  %s352_s1, 1024, %s308_s12, [#allocation6], %s288_s0, %s288_s0, %s289_s3  }
  0x23   :  { %280 = dma.done.wait [#allocation3], 128  }
  0x24   :  { %281 = vsyncadd [#allocation3], 4294967168 }
  0x25   :  { %282 = dma.done.wait [#allocation6], 1024  }
  0x26   :  { %283 = vsyncadd [#allocation6], 4294966272  ;;  %v290_v0 = vmov 0.0   ;;  %vm291_vm0 = vmmov 0   ;;  %v206_v1 = vld [vmem:[#allocation5] sm:$0xff]   ;;  %v207_v2 = vld [vmem:[#allocation5 + $0x8] sm:$0xff]  }
  0x27   :  { %179 = vmatprep.subr.bf16.mxu0 %v290_v0  ;;  %195 = vmatprep.mubr.msk.bf16.mxu0 %vm291_vm0, %v290_v0  ;;  %v208_v3 = vld [vmem:[#allocation5 + $0x10] sm:$0xff]   ;;  %v209_v4 = vld [vmem:[#allocation5 + $0x18] sm:$0xff]   ;;  %v210_v5 = vld [vmem:[#allocation5 + $0x20] sm:$0xff]   ;;  %s292_s1 = smov [#allocation7]  }
  0x28   :  { %180 = vmatpush3.bf16.msra.mxu0 %v206_v1  ;;  %v211_v6 = vld [vmem:[#allocation5 + $0x28] sm:$0xff]   ;;  %v212_v7 = vld [vmem:[#allocation5 + $0x30] sm:$0xff]   ;;  %v213_v8 = vld [vmem:[#allocation5 + $0x38] sm:$0xff]   ;;  %s152_s6 = sshll.u32 %s292_s1, 4  ;;  %s153_s6 = int_to_ptr.vmem [resolvable:$true] %s152_s6 }
  0x29   :  { %181 = vmatprep.subr.bf16.mxu0 %v290_v0  ;;  %v39_v9 = vld [vmem:[#allocation2] sm:$0xff]  ;;  %s258_s7 = scalar_lea.vmem %s153_s6, 128  ;;  %p263_p3 = scmp.lt.s32.totalorder %s153_s6, %s153_s6 }
  0x2a   :  { %v40_v10 = vpack.c.bf16 %v39_v9, %v39_v9  ;;  %p259_p2 = scmp.ne.s32.totalorder %s153_s6, %s258_s7  ;;  %p264_p4 = scmp.lt.s32.totalorder %s258_s7, %s258_s7 }
  0x2c   :  { %182 = vmatpush3.bf16.msra.mxu0 %v207_v2  ;;  %p265_p5 = por %p264_p4, %p263_p3 }
  0x2d   :  { %183 = vmatprep.subr.bf16.mxu0 %v290_v0 }
  0x2e   :  { %p266_p6 = pnand %p265_p5, %p259_p2 }
  0x30   :  { %184 = vmatpush3.bf16.msra.mxu0 %v208_v3 }
  0x31   :  { %185 = vmatprep.subr.bf16.mxu0 %v290_v0 }
  0x34   :  { %186 = vmatpush3.bf16.msra.mxu0 %v209_v4 }
  0x35   :  { %187 = vmatprep.subr.bf16.mxu0 %v290_v0 }
  0x38   :  { %188 = vmatpush3.bf16.msra.mxu0 %v210_v5 }
  0x39   :  { %189 = vmatprep.subr.bf16.mxu0 %v290_v0 }
  0x3c   :  { %190 = vmatpush3.bf16.msra.mxu0 %v211_v6 }
  0x3d   :  { %191 = vmatprep.subr.bf16.mxu0 %v290_v0 }
  0x40   :  { %192 = vmatpush3.bf16.msra.mxu0 %v212_v7 }
  0x41   :  { %193 = vmatprep.subr.bf16.mxu0 %v290_v0 }
  0x44   :  { %194 = vmatpush3.bf16.msra.mxu0 %v213_v8 }
  0x47   :  { %196 = vmatmul.mubr.bf16.vlgmr.msra.gmra.mrb[0].mxu0 %v40_v10 }
 0x11a   :  { %v139_v11 = vpop.f32.mrb[0].mxu0 }
 0x11b   :  { %145 = vst [vmem:[#allocation7] sm:$0xff] %v139_v11  ;;  %v197_v12 = vpop.f32.mrb[1].mxu0 }
 0x11c   :  { %v142_v13 = vpop.f32.mrb[2].mxu0 }
 0x11d   :  { %269 = shalt.err (!%p266_p6)
}
 0x11e   :  { %s270_s10 = scalar_lea.hbm %s353_s2, 128 }
 0x11f   :  { %p271_p7 = scmp.ne.s32.totalorder %s353_s2, %s270_s10  ;;  %p274_p8 = scmp.lt.u32.totalorder %s270_s10, %s353_s2 }
 0x121   :  { %p276_p9 = pnand %p274_p8, %p271_p7 }
 0x123   :  { %279 = shalt.err (!%p276_p9)
}
 0x124   :  { %155 = dma.vmem_to_hbm [thread:$0]  %s153_s6, 128, %s353_s2, [#allocation4]   ;;  %v198_v14 = vpop.f32.mrb[3].mxu0 }
 0x125   :  { %284 = dma.done.wait [#allocation4], 128  }
 0x126   :  { %285 = vsyncadd [#allocation4], 4294967168 }
 0x127   :  { %159 = vsyncpa [#allocation3], 1 }
 0x128   :  { %160 = vsyncpa [#allocation6], 1 }
 0x129   :  { %161 = vsyncpa [#allocation4], 1 }

</bundles_post_ra>
